<compile_context>
chip_gen: v6e
topology: v6e:2x2x1
jax: 0.10.0
libtpu: 0.0.40
codegen_flags: <defaults>
</compile_context>

<pallas_src>
import functools

import numpy as np
import jax
import jax.numpy as jnp
from jax.experimental import pallas as pl
from jax.experimental.pallas import tpu as pltpu


def _pool_conv_bn_relu_kernel(x_ref, m_ref, w_ref, b_ref, s_ref, o_ref):
    # x_ref: (TB*C, HW)       bf16 lane-dense rows of NCHW for TB batch images
    # m_ref: (HW, Kpad)       bf16 binary selection matrix [sum over W | sum over H | zeros]
    # w_ref: (TB*Cr, TB*C)    f32 block-diagonal 1x1-conv weight with BN scale folded in
    # b_ref: (TB*Cr, 1)       f32 folded BN bias
    # s_ref: (1, Kpad)        f32 per-column pooling scale [1/W | 1/H | 0]
    # o_ref: (1, TB*Cr, Kpad)
    sums = jnp.dot(x_ref[...], m_ref[...],
                   preferred_element_type=jnp.float32)       # (TB*C, Kpad) pooling sums on MXU
    y = jnp.dot(w_ref[...], sums,
                preferred_element_type=jnp.float32)          # (TB*Cr, Kpad) 1x1 conv (+BN scale)
    o_ref[0] = jnp.maximum(y * s_ref[...] + b_ref[...], 0.0)  # mean scale + BN bias + ReLU


def _device_kind():
    try:
        return jax.devices()[0].device_kind.lower()
    except Exception:
        return ""


def _tpu_vmem_bytes():
    """Physical VMEM per TensorCore, with safe fallbacks."""
    try:
        info = pltpu.get_tpu_info()
        for attr in ("vmem_capacity_bytes", "vmem_size_bytes", "vmem_bytes"):
            v = getattr(info, attr, None)
            if isinstance(v, int) and v > 0:
                return v
    except Exception:
        pass
    kind = _device_kind()
    if "v7" in kind or "tpu7" in kind:
        return 64 << 20
    return 128 << 20          # v5e / v6e / older


def _num_tensorcores():
    """TensorCores sharing one Pallas grid (megacore).  v4/v5p/v7x: 2, else 1."""
    kind = _device_kind()
    if any(t in kind for t in ("v4", "v5p", "v7", "tpu7")):
        return 2
    return 1


def _choose_batch_tile(N, C, HW, Cr, Kpad, vmem_limit, num_tc):
    """Largest batch tile whose blocks fit the VMEM budget; balance grid across TCs."""
    def fits(tb):
        if N % tb:
            return False
        if (tb * C) % 8 and tb != N:              # x-block second-minor dim must be 8-aligned
            return False
        x_blk = 2 * (tb * C) * HW * 2             # bf16 input, double-buffered
        pool = 2 * HW * Kpad * 2                  # bf16 selection matrix (worst case 2 bufs)
        w = 2 * (tb * Cr) * (tb * C) * 4          # f32 block-diagonal weight
        small = 2 * ((tb * Cr) * 128 + Kpad) * 4  # bias (lane padded) + column scale
        o_blk = 2 * (tb * Cr) * Kpad * 4          # f32 output block
        return x_blk + pool + w + small + o_blk <= int(0.8 * vmem_limit)

    cands = [tb for tb in range(1, N + 1) if fits(tb)]
    if not cands:
        # TODO(synk): inputs whose (C, H*W) slab exceeds VMEM need an extra 'arbitrary'
        # HW-chunked reduction grid axis with an f32 partial-sum scratch (pl.when init/finalize).
        return 1
    if num_tc > 1:
        balanced = [tb for tb in cands if (N // tb) >= num_tc and (N // tb) % num_tc == 0]
        if balanced:
            return max(balanced)
    return max(cands)


@functools.lru_cache(maxsize=None)
def _pool_constants(H, W, Kpad):
    """Cached binary pooling-selection matrix (bf16) and f32 per-column mean scale."""
    HW = H * W
    sel = np.zeros((HW, Kpad), dtype=np.float32)
    rows = np.arange(HW)
    sel[rows, rows // W] = 1.0        # columns [0:H]   : sum over W  -> x_h
    sel[rows, H + rows % W] = 1.0     # columns [H:H+W] : sum over H  -> x_w
    scale = np.zeros((1, Kpad), dtype=np.float32)
    scale[0, :H] = 1.0 / W
    scale[0, H:H + W] = 1.0 / H
    return jnp.asarray(sel, dtype=jnp.bfloat16), jnp.asarray(scale, dtype=jnp.float32)


def spatial_attention(x, conv_w, bn_gamma, bn_beta, bn_mean, bn_var, eps=1e-5):
    """x: (N, C, H, W); conv_w: (Cr, C) 1x1 conv (no bias); bn_*: (Cr,).

    Returns (F_h, F_w) of shapes (N, Cr, 1, H) and (N, Cr, 1, W), matching the PyTorch
    forward with eval-mode BatchNorm.
    """
    N, C, H, W = x.shape
    Cr = conv_w.shape[0]
    HW, K = H * W, H + W
    Kpad = max(128, ((K + 127) // 128) * 128)     # lane-dense, unmasked output stores

    f32, bf16 = jnp.float32, jnp.bfloat16

    vmem_limit = min(96 << 20, int(_tpu_vmem_bytes() * 3 // 4))
    num_tc = _num_tensorcores()
    TB = _choose_batch_tile(N, C, HW, Cr, Kpad, vmem_limit, num_tc)
    G = N // TB

    # Fold eval-mode BatchNorm into the conv weight and a per-channel bias.
    # TODO(synk): training-mode BatchNorm (batch statistics) is not reproduced.
    inv_std = 1.0 / jnp.sqrt(bn_var.astype(f32) + eps)
    bn_scale = bn_gamma.astype(f32) * inv_std                            # (Cr,)
    w_scaled = bn_scale[:, None] * conv_w.astype(f32)                    # (Cr, C)
    bias = bn_beta.astype(f32) - bn_mean.astype(f32) * bn_scale          # (Cr,)

    # Block-diagonal weight mixes TB images with one 2-D matmul; matching tiled bias.
    w_big = jnp.kron(jnp.eye(TB, dtype=f32), w_scaled)                   # (TB*Cr, TB*C)
    bias_big = jnp.tile(bias.reshape(Cr, 1), (TB, 1))                    # (TB*Cr, 1)

    pool_sel, pool_scale = _pool_constants(H, W, Kpad)

    # bf16 halves the dominant HBM read of x (in a fused model the cast folds into the
    # producer of x); means stay exact up to the bf16 input rounding thanks to the binary
    # selection matrix, f32 accumulation, and the f32 per-column 1/W, 1/H scale.
    x_flat = x.astype(bf16).reshape(N * C, HW)

    def run(single_buffer_constants):
        def const_spec(shape):
            idx = lambda g: (0,) * len(shape)
            if single_buffer_constants:
                return pl.BlockSpec(shape, idx, pipeline_mode=pl.Buffered(1))
            return pl.BlockSpec(shape, idx)

        return pl.pallas_call(
            _pool_conv_bn_relu_kernel,
            out_shape=jax.ShapeDtypeStruct((G, TB * Cr, Kpad), f32),
            grid_spec=pltpu.PrefetchScalarGridSpec(
                num_scalar_prefetch=0,
                grid=(G,),
                in_specs=[
                    pl.BlockSpec((TB * C, HW), lambda g: (g, 0)),   # TB images (bf16, 2-buffered)
                    const_spec((HW, Kpad)),                         # pooling selection matrix
                    const_spec((TB * Cr, TB * C)),                  # folded conv weight
                    const_spec((TB * Cr, 1)),                       # folded BN bias
                    const_spec((1, Kpad)),                          # per-column mean scale
                ],
                out_specs=pl.BlockSpec((1, TB * Cr, Kpad), lambda g: (g, 0, 0)),
            ),
            compiler_params=pltpu.CompilerParams(
                dimension_semantics=("parallel",),
                vmem_limit_bytes=vmem_limit,
            ),
        )(x_flat, pool_sel, w_big, bias_big, pool_scale)

    try:
        out = run(True)
    except Exception:
        # Fallback if pipeline_mode=pl.Buffered(1) is not supported by this jax/libtpu.
        out = run(False)

    # Rows of each output block are ordered (batch-in-tile, out-channel) -> plain reshape.
    y = out.reshape(N, Cr, Kpad)
    f_h = y[:, :, :H][:, :, None, :]                                     # (N, Cr, 1, H)
    f_w = y[:, :, H:K][:, :, None, :]                                    # (N, Cr, 1, W)
    return f_h, f_w


def reference(x, conv_w, bn_gamma, bn_beta, bn_mean, bn_var, eps=1e-5):
    """Pure-JAX f32 reference mirroring the PyTorch forward (eval-mode BN)."""
    N, C, H, W = x.shape
    x_h = jnp.mean(x, axis=3, keepdims=True).transpose(0, 1, 3, 2)       # (N,C,1,H)
    x_w = jnp.mean(x, axis=2, keepdims=True)                             # (N,C,1,W)
    t = jnp.concatenate([x_h, x_w], axis=3)                              # (N,C,1,H+W)
    y = jnp.einsum('oc,nclk->nolk', conv_w, t)                           # (N,Cr,1,H+W)
    g = bn_gamma[None, :, None, None]
    b = bn_beta[None, :, None, None]
    m = bn_mean[None, :, None, None]
    v = bn_var[None, :, None, None]
    y = (y - m) / jnp.sqrt(v + eps) * g + b
    y = jnp.maximum(y, 0.0)
    return y[..., :H], y[..., H:]


if __name__ == "__main__":
    # Config 1: channel=32, reduction=16 -> Cr=2, N=2.
    # Config 2: N=8, H != W -> exercises batch tiling + the block-diagonal weight path.
    configs = [(2, 32, 16, 16, 16), (8, 32, 16, 8, 16)]

    for (N, C, H, W, reduction) in configs:
        Cr = C // reduction
        key = jax.random.PRNGKey(0)
        kx, kw, kg, kb, km, kv = jax.random.split(key, 6)

        x = jax.random.normal(kx, (N, C, H, W), dtype=jnp.float32)
        conv_w = jax.random.normal(kw, (Cr, C), dtype=jnp.float32) * (1.0 / jnp.sqrt(C))
        bn_gamma = 1.0 + 0.1 * jax.random.normal(kg, (Cr,), dtype=jnp.float32)
        bn_beta = 0.1 * jax.random.normal(kb, (Cr,), dtype=jnp.float32)
        bn_mean = 0.05 * jax.random.normal(km, (Cr,), dtype=jnp.float32)
        bn_var = 0.5 + jnp.abs(jax.random.normal(kv, (Cr,), dtype=jnp.float32)) * 0.5

        out_h, out_w = spatial_attention(x, conv_w, bn_gamma, bn_beta, bn_mean, bn_var)
        jax.block_until_ready(out_h)
        jax.block_until_ready(out_w)

        ref_h, ref_w = reference(x, conv_w, bn_gamma, bn_beta, bn_mean, bn_var)
        assert out_h.shape == (N, Cr, 1, H) and out_w.shape == (N, Cr, 1, W)
        # bf16 input stream -> compare against the f32 reference at bf16-level tolerance.
        assert jnp.allclose(out_h, ref_h, atol=2e-2, rtol=2e-2)
        assert jnp.allclose(out_w, ref_w, atol=2e-2, rtol=2e-2)

    print("KERNEL_OK")
</pallas_src>

<mosaic_0001>
module attributes {stable_mosaic.version = 11 : i64} {
  func.func @_pool_conv_bn_relu_kernel(%arg0: i32, %arg1: memref<64x256xbf16, #tpu.memory_space<vmem>>, %arg2: memref<256x128xbf16, #tpu.memory_space<vmem>>, %arg3: memref<4x64xf32, #tpu.memory_space<vmem>>, %arg4: memref<4x1xf32, #tpu.memory_space<vmem>>, %arg5: memref<1x128xf32, #tpu.memory_space<vmem>>, %arg6: memref<1x4x128xf32, #tpu.memory_space<vmem>>) attributes {dimension_semantics = [#tpu.dimension_semantics<parallel>], iteration_bounds = array<i64: 1>, scalar_prefetch = 0 : i64, scratch_operands = 0 : i64, tpu.core_type = #tpu.core_type<tc>, window_params = [{transform_indices = @transform_0, window_bounds = array<i64: 64, 256>}, {pipeline_mode = #tpu.pipeline_mode<synchronous>, transform_indices = @transform_1, window_bounds = array<i64: 256, 128>}, {pipeline_mode = #tpu.pipeline_mode<synchronous>, transform_indices = @transform_2, window_bounds = array<i64: 4, 64>}, {pipeline_mode = #tpu.pipeline_mode<synchronous>, transform_indices = @transform_3, window_bounds = array<i64: 4, 1>}, {pipeline_mode = #tpu.pipeline_mode<synchronous>, transform_indices = @transform_4, window_bounds = array<i64: 1, 128>}, {transform_indices = @transform_5, window_bounds = array<i64: 1, 4, 128>}]} {
    %c0 = arith.constant 0 : index
    %c0_0 = arith.constant 0 : index
    %0 = vector.load %arg1[%c0, %c0_0] : memref<64x256xbf16, #tpu.memory_space<vmem>>, vector<64x256xbf16>
    %c0_1 = arith.constant 0 : index
    %c0_2 = arith.constant 0 : index
    %1 = vector.load %arg2[%c0_1, %c0_2] : memref<256x128xbf16, #tpu.memory_space<vmem>>, vector<256x128xbf16>
    %cst = arith.constant dense<0.000000e+00> : vector<64x128xf32>
    %2 = tpu.matmul %0, %1, %cst {dimension_numbers = #tpu.dot_dimension_numbers<[1], [0], [0], [1], [0, 0, 1, 1], [], []>} : vector<64x256xbf16>, vector<256x128xbf16>, vector<64x128xf32> -> vector<64x128xf32>
    %c0_3 = arith.constant 0 : index
    %c0_4 = arith.constant 0 : index
    %3 = vector.load %arg3[%c0_3, %c0_4] : memref<4x64xf32, #tpu.memory_space<vmem>>, vector<4x64xf32>
    %cst_5 = arith.constant dense<0.000000e+00> : vector<4x128xf32>
    %4 = tpu.matmul %3, %2, %cst_5 {dimension_numbers = #tpu.dot_dimension_numbers<[1], [0], [0], [1], [0, 0, 1, 1], [], []>} : vector<4x64xf32>, vector<64x128xf32>, vector<4x128xf32> -> vector<4x128xf32>
    %c0_6 = arith.constant 0 : index
    %c0_7 = arith.constant 0 : index
    %5 = vector.load %arg5[%c0_6, %c0_7] : memref<1x128xf32, #tpu.memory_space<vmem>>, vector<1x128xf32>
    %6 = vector.broadcast %5 : vector<1x128xf32> to vector<4x128xf32>
    %7 = arith.mulf %4, %6 : vector<4x128xf32>
    %c0_8 = arith.constant 0 : index
    %c0_9 = arith.constant 0 : index
    %8 = vector.load %arg4[%c0_8, %c0_9] : memref<4x1xf32, #tpu.memory_space<vmem>>, vector<4x1xf32>
    %9 = vector.broadcast %8 : vector<4x1xf32> to vector<4x128xf32>
    %10 = arith.addf %7, %9 : vector<4x128xf32>
    %cst_10 = arith.constant 0.000000e+00 : f32
    %11 = vector.broadcast %cst_10 : f32 to vector<4x128xf32>
    %12 = arith.maximumf %10, %11 : vector<4x128xf32>
    %c0_11 = arith.constant 0 : index
    %c0_12 = arith.constant 0 : index
    %c0_13 = arith.constant 0 : index
    %13 = vector.load %arg6[%c0_11, %c0_12, %c0_13] : memref<1x4x128xf32, #tpu.memory_space<vmem>>, vector<1x4x128xf32>
    %14 = vector.shape_cast %13 : vector<1x4x128xf32> to vector<4x128xf32>
    %15 = vector.shape_cast %12 : vector<4x128xf32> to vector<1x4x128xf32>
    tpu.vector_store %arg6[%c0_11, %c0_12, %c0_13], %15 {strides = array<i32>} : memref<1x4x128xf32, #tpu.memory_space<vmem>>, vector<1x4x128xf32>,
    return
  }
  func.func @transform_0(%arg0: i32) -> (i32, i32) {
    %c0_i32 = arith.constant 0 : i32
    %c0_i32_0 = arith.constant 0 : i32
    return %arg0, %c0_i32 : i32, i32
  }
  func.func @transform_1(%arg0: i32) -> (i32, i32) {
    %c0_i32 = arith.constant 0 : i32
    %c0_i32_0 = arith.constant 0 : i32
    %c0_i32_1 = arith.constant 0 : i32
    return %c0_i32, %c0_i32_0 : i32, i32
  }
  func.func @transform_2(%arg0: i32) -> (i32, i32) {
    %c0_i32 = arith.constant 0 : i32
    %c0_i32_0 = arith.constant 0 : i32
    %c0_i32_1 = arith.constant 0 : i32
    return %c0_i32, %c0_i32_0 : i32, i32
  }
  func.func @transform_3(%arg0: i32) -> (i32, i32) {
    %c0_i32 = arith.constant 0 : i32
    %c0_i32_0 = arith.constant 0 : i32
    %c0_i32_1 = arith.constant 0 : i32
    return %c0_i32, %c0_i32_0 : i32, i32
  }
  func.func @transform_4(%arg0: i32) -> (i32, i32) {
    %c0_i32 = arith.constant 0 : i32
    %c0_i32_0 = arith.constant 0 : i32
    %c0_i32_1 = arith.constant 0 : i32
    return %c0_i32, %c0_i32_0 : i32, i32
  }
  func.func @transform_5(%arg0: i32) -> (i32, i32, i32) {
    %c0_i32 = arith.constant 0 : i32
    %c0_i32_0 = arith.constant 0 : i32
    %c0_i32_1 = arith.constant 0 : i32
    return %arg0, %c0_i32, %c0_i32_0 : i32, i32, i32
  }
}

module attributes {stable_mosaic.version = 11 : i64} {
  func.func @_pool_conv_bn_relu_kernel(%arg0: i32, %arg1: memref<64x256xbf16, #tpu.memory_space<vmem>>, %arg2: memref<256x128xbf16, #tpu.memory_space<vmem>>, %arg3: memref<4x64xf32, #tpu.memory_space<vmem>>, %arg4: memref<4x1xf32, #tpu.memory_space<vmem>>, %arg5: memref<1x128xf32, #tpu.memory_space<vmem>>, %arg6: memref<1x4x128xf32, #tpu.memory_space<vmem>>) attributes {dimension_semantics = [#tpu.dimension_semantics<parallel>], iteration_bounds = array<i64: 1>, scalar_prefetch = 0 : i64, scratch_operands = 0 : i64, tpu.core_type = #tpu.core_type<tc>, window_params = [{transform_indices = @transform_0, window_bounds = array<i64: 64, 256>}, {pipeline_mode = #tpu.pipeline_mode<synchronous>, transform_indices = @transform_1, window_bounds = array<i64: 256, 128>}, {pipeline_mode = #tpu.pipeline_mode<synchronous>, transform_indices = @transform_2, window_bounds = array<i64: 4, 64>}, {pipeline_mode = #tpu.pipeline_mode<synchronous>, transform_indices = @transform_3, window_bounds = array<i64: 4, 1>}, {pipeline_mode = #tpu.pipeline_mode<synchronous>, transform_indices = @transform_4, window_bounds = array<i64: 1, 128>}, {transform_indices = @transform_5, window_bounds = array<i64: 1, 4, 128>}]} {
    %c0 = arith.constant 0 : index
    %c0_0 = arith.constant 0 : index
    %0 = vector.load %arg1[%c0, %c0_0] : memref<64x256xbf16, #tpu.memory_space<vmem>>, vector<64x256xbf16>
    %c0_1 = arith.constant 0 : index
    %c0_2 = arith.constant 0 : index
    %1 = vector.load %arg2[%c0_1, %c0_2] : memref<256x128xbf16, #tpu.memory_space<vmem>>, vector<256x128xbf16>
    %cst = arith.constant dense<0.000000e+00> : vector<64x128xf32>
    %2 = tpu.matmul %0, %1, %cst {dimension_numbers = #tpu.dot_dimension_numbers<[1], [0], [0], [1], [0, 0, 1, 1], [], []>} : vector<64x256xbf16>, vector<256x128xbf16>, vector<64x128xf32> -> vector<64x128xf32>
    %c0_3 = arith.constant 0 : index
    %c0_4 = arith.constant 0 : index
    %3 = vector.load %arg3[%c0_3, %c0_4] : memref<4x64xf32, #tpu.memory_space<vmem>>, vector<4x64xf32>
    %cst_5 = arith.constant dense<0.000000e+00> : vector<4x128xf32>
    %4 = tpu.matmul %3, %2, %cst_5 {dimension_numbers = #tpu.dot_dimension_numbers<[1], [0], [0], [1], [0, 0, 1, 1], [], []>} : vector<4x64xf32>, vector<64x128xf32>, vector<4x128xf32> -> vector<4x128xf32>
    %c0_6 = arith.constant 0 : index
    %c0_7 = arith.constant 0 : index
    %5 = vector.load %arg5[%c0_6, %c0_7] : memref<1x128xf32, #tpu.memory_space<vmem>>, vector<1x128xf32>
    %6 = vector.broadcast %5 : vector<1x128xf32> to vector<4x128xf32>
    %7 = arith.mulf %4, %6 : vector<4x128xf32>
    %c0_8 = arith.constant 0 : index
    %c0_9 = arith.constant 0 : index
    %8 = vector.load %arg4[%c0_8, %c0_9] : memref<4x1xf32, #tpu.memory_space<vmem>>, vector<4x1xf32>
    %9 = vector.broadcast %8 : vector<4x1xf32> to vector<4x128xf32>
    %10 = arith.addf %7, %9 : vector<4x128xf32>
    %cst_10 = arith.constant 0.000000e+00 : f32
    %11 = vector.broadcast %cst_10 : f32 to vector<4x128xf32>
    %12 = arith.maximumf %10, %11 : vector<4x128xf32>
    %c0_11 = arith.constant 0 : index
    %c0_12 = arith.constant 0 : index
    %c0_13 = arith.constant 0 : index
    %13 = vector.load %arg6[%c0_11, %c0_12, %c0_13] : memref<1x4x128xf32, #tpu.memory_space<vmem>>, vector<1x4x128xf32>
    %14 = vector.shape_cast %13 : vector<1x4x128xf32> to vector<4x128xf32>
    %15 = vector.shape_cast %12 : vector<4x128xf32> to vector<1x4x128xf32>
    tpu.vector_store %arg6[%c0_11, %c0_12, %c0_13], %15 {strides = array<i32>} : memref<1x4x128xf32, #tpu.memory_space<vmem>>, vector<1x4x128xf32>,
    return
  }
  func.func @transform_0(%arg0: i32) -> (i32, i32) {
    %c0_i32 = arith.constant 0 : i32
    %c0_i32_0 = arith.constant 0 : i32
    return %arg0, %c0_i32 : i32, i32
  }
  func.func @transform_1(%arg0: i32) -> (i32, i32) {
    %c0_i32 = arith.constant 0 : i32
    %c0_i32_0 = arith.constant 0 : i32
    %c0_i32_1 = arith.constant 0 : i32
    return %c0_i32, %c0_i32_0 : i32, i32
  }
  func.func @transform_2(%arg0: i32) -> (i32, i32) {
    %c0_i32 = arith.constant 0 : i32
    %c0_i32_0 = arith.constant 0 : i32
    %c0_i32_1 = arith.constant 0 : i32
    return %c0_i32, %c0_i32_0 : i32, i32
  }
  func.func @transform_3(%arg0: i32) -> (i32, i32) {
    %c0_i32 = arith.constant 0 : i32
    %c0_i32_0 = arith.constant 0 : i32
    %c0_i32_1 = arith.constant 0 : i32
    return %c0_i32, %c0_i32_0 : i32, i32
  }
  func.func @transform_4(%arg0: i32) -> (i32, i32) {
    %c0_i32 = arith.constant 0 : i32
    %c0_i32_0 = arith.constant 0 : i32
    %c0_i32_1 = arith.constant 0 : i32
    return %c0_i32, %c0_i32_0 : i32, i32
  }
  func.func @transform_5(%arg0: i32) -> (i32, i32, i32) {
    %c0_i32 = arith.constant 0 : i32
    %c0_i32_0 = arith.constant 0 : i32
    %c0_i32_1 = arith.constant 0 : i32
    return %arg0, %c0_i32, %c0_i32_0 : i32, i32, i32
  }
}

</mosaic_0001>

<bundles_post_ra>
// kernel: tpu_custom_call.1
= control target key start
LH: loop header
LB: loop body
LE: loop exit
PB: predicated region body
PF: predicated region fallthrough
CT: control target
= control target key end

     0   :  { %10 = vsyncpa [#allocation3], 0  ;;  %s672_s0 = inlined_call_operand.hbm [shape: bf16[64,256], index: 0, kind: input, shape index: {}]   ;;  %s673_s1 = inlined_call_operand.hbm [shape: bf16[256,128], index: 1, kind: input, shape index: {}]   ;;  %s674_s2 = inlined_call_operand.vmem [shape: f32[4,64], index: 2, kind: input, shape index: {}]   ;;  %s675_s3 = inlined_call_operand.vmem [shape: f32[4,1], index: 3, kind: input, shape index: {}]   ;;  %s676_s4 = inlined_call_operand.vmem [shape: f32[1,128], index: 4, kind: input, shape index: {}]   ;;  %s677_s5 = inlined_call_operand.hbm [shape: f32[1,4,128], index: 5, kind: output, shape index: {}]  }
   0x1   :  { %11 = vsyncpa [#allocation6], 0 }
   0x2   :  { %12 = vsyncpa [#allocation4], 0  ;;  %s614_s18 = smov [#allocation2]  }
   0x3   :  { %s18_s19 = sshll.u32 %s614_s18, 4  ;;  %s19_s19 = int_to_ptr.vmem [resolvable:$true] %s18_s19 }
   0x4   :  { %s556_s20 = scalar_lea.vmem %s19_s19, 1024  ;;  %p561_p1 = scmp.lt.s32.totalorder %s19_s19, %s19_s19 }
   0x5   :  { %p557_p0 = scmp.ne.s32.totalorder %s19_s19, %s556_s20  ;;  %p562_p2 = scmp.lt.s32.totalorder %s556_s20, %s556_s20 }
   0x7   :  { %p563_p3 = por %p562_p2, %p561_p1 }
   0x9   :  { %p564_p4 = pnand %p563_p3, %p557_p0 }
   0xb   :  { %567 = shalt.err (!%p564_p4)
}
   0xc   :  { %s615_s21 = smov 128   ;;  %s616_s22 = smov 8  }
   0xd   :  { %24 = dma.hbm_to_vmem [thread:$0]  %s672_s0, 1024, %s19_s19, [#allocation3], %s615_s21, %s615_s21, %s616_s22  }
   0xe   :  { %s617_s25 = smov [#allocation5]  }
   0xf   :  { %s30_s26 = sshll.u32 %s617_s25, 4  ;;  %s31_s26 = int_to_ptr.vmem [resolvable:$true] %s30_s26 }
  0x10   :  { %s576_s27 = scalar_lea.vmem %s31_s26, 2048  ;;  %p581_p6 = scmp.lt.s32.totalorder %s31_s26, %s31_s26 }
  0x11   :  { %p577_p5 = scmp.ne.s32.totalorder %s31_s26, %s576_s27  ;;  %p582_p7 = scmp.lt.s32.totalorder %s576_s27, %s576_s27 }
  0x13   :  { %p583_p8 = por %p582_p7, %p581_p6 }
  0x15   :  { %p584_p9 = pnand %p583_p8, %p577_p5 }
  0x17   :  { %587 = shalt.err (!%p584_p9)
}
  0x18   :  { %s618_s28 = smov 64   ;;  %s619_s29 = smov 4  }
  0x19   :  { %36 = dma.hbm_to_vmem [thread:$0]  %s673_s1, 2048, %s31_s26, [#allocation6], %s618_s28, %s618_s28, %s619_s29  }
  0x1a   :  { %608 = dma.done.wait [#allocation3], 1024  }
  0x1b   :  { %609 = vsyncadd [#allocation3], 4294966272 }
  0x1c   :  { %610 = dma.done.wait [#allocation6], 2048  }
  0x1d   :  { %611 = vsyncadd [#allocation6], 4294965248  ;;  %v520_v0 = vld [vmem:[#allocation5 + $0x78] sm:$0xff]   ;;  %v522_v2 = vld [vmem:[#allocation5 + $0x70] sm:$0xff]   ;;  %v620_v24 = vmov 0.0   ;;  %vm621_vm0 = vmmov 0  }
  0x1e   :  { %v521_v1 = vld [vmem:[#allocation5 + $0x38] sm:$0xff]   ;;  %493 = vmatprep.subr.bf16.mxu1 %v520_v0  ;;  %425 = vmatprep.subr.bf16.mxu0 %v520_v0  ;;  %v523_v3 = vld [vmem:[#allocation5 + $0x30] sm:$0xff]   ;;  %v524_v4 = vld [vmem:[#allocation5 + $0x68] sm:$0xff]   ;;  %v622_v26 = vmov 0   ;;  %vm292_vm1 = vcmask 523264   ;;  %s623_s10 = smov [#allocation7]  }
  0x1f   :  { %501 = vmatpush3.bf16.msra.mxu1 %v521_v1  ;;  %426 = vmatpush3.bf16.msra.mxu0 %v521_v1  ;;  %v525_v5 = vld [vmem:[#allocation5 + $0x28] sm:$0xff]   ;;  %v526_v6 = vld [vmem:[#allocation5 + $0x60] sm:$0xff]   ;;  %v528_v8 = vld [vmem:[#allocation5 + $0x58] sm:$0xff]   ;;  %s389_s11 = sshll.u32 %s623_s10, 4  ;;  %s390_s11 = int_to_ptr.vmem [resolvable:$true] %s389_s11 }
  0x20   :  { %494 = vmatprep.subr.bf16.mxu1 %v522_v2  ;;  %427 = vmatprep.subr.bf16.mxu0 %v522_v2  ;;  %v527_v7 = vld [vmem:[#allocation5 + $0x20] sm:$0xff]   ;;  %v529_v9 = vld [vmem:[#allocation5 + $0x18] sm:$0xff]   ;;  %v530_v10 = vld [vmem:[#allocation5 + $0x50] sm:$0xff]   ;;  %s588_s12 = scalar_lea.vmem %s390_s11, 64  ;;  %p593_p11 = scmp.lt.s32.totalorder %s390_s11, %s390_s11 }
  0x21   :  { %v538_v11 = vld [vmem:[#allocation2 + $0x24] ss:$8 sps:$4 sm:$0xff]   ;;  %v531_v13 = vld [vmem:[#allocation5 + $0x10] sm:$0xff]   ;;  %v536_v18 = vld [vmem:[#allocation2 + $0x20] ss:$8 sps:$4 sm:$0xff]   ;;  %519 = vset.pattern.permute.xlu0 %v622_v26  ;;  %p589_p10 = scmp.ne.s32.totalorder %s390_s11, %s588_s12  ;;  %p594_p12 = scmp.lt.s32.totalorder %s588_s12, %s588_s12 }
  0x22   :  { %v541_v12 = vld [vmem:[#allocation2 + $0x4] ss:$8 sps:$4 sm:$0xff]   ;;  %274 = vmatprep.mubr.bf16.mxu1 %v538_v11  ;;  %v539_v19 = vld [vmem:[#allocation2] ss:$8 sps:$4 sm:$0xff]   ;;  %v542_v20 = vld [vmem:[#allocation2 + $0x34] ss:$8 sps:$4 sm:$0xff]  }
  0x23   :  { %502 = vmatpush3.bf16.msra.mxu1 %v523_v3  ;;  %428 = vmatpush3.bf16.msra.mxu0 %v523_v3  ;;  %v532_v14 = vld [vmem:[#allocation5 + $0x48] sm:$0xff]   ;;  %v534_v16 = vld [vmem:[#allocation5 + $0x40] sm:$0xff]   ;;  %v545_v21 = vld [vmem:[#allocation2 + $0x14] ss:$8 sps:$4 sm:$0xff]   ;;  %p595_p13 = por %p594_p12, %p593_p11 }
  0x24   :  { %495 = vmatprep.subr.bf16.mxu1 %v524_v4  ;;  %429 = vmatprep.subr.bf16.mxu0 %v524_v4  ;;  %v533_v15 = vld [vmem:[#allocation5 + $0x8] sm:$0xff]   ;;  %v535_v17 = vld [vmem:[#allocation5] sm:$0xff]   ;;  %v544_v22 = vld [vmem:[#allocation2 + $0x30] ss:$8 sps:$4 sm:$0xff]  }
  0x25   :  { %258 = vmatprep.mubr.bf16.mxu0 %v541_v12  ;;  %v547_v23 = vld [vmem:[#allocation2 + $0x10] ss:$8 sps:$4 sm:$0xff]   ;;  %v374_v25 = vld [vmem:[%s675_s3] sm:$0xf]  ;;  %p596_p0 = pnand %p595_p13, %p589_p10 }
  0x26   :  { %377 = vperm.xlu0 %519, %v374_v25   ;;  %v291_v51 = vld [vmem:[%s674_s2] sm:$0xf] }
  0x27   :  { %503 = vmatpush3.bf16.msra.mxu1 %v525_v5  ;;  %430 = vmatpush3.bf16.msra.mxu0 %v525_v5  ;;  %v424_v52 = vld [vmem:[%s676_s4] ss:$0 sm:$0xff] }
  0x28   :  { %496 = vmatprep.subr.bf16.mxu1 %v526_v6  ;;  %431 = vmatprep.subr.bf16.mxu0 %v526_v6 }
  0x2b   :  { %504 = vmatpush3.bf16.msra.mxu1 %v527_v7  ;;  %432 = vmatpush3.bf16.msra.mxu0 %v527_v7 }
  0x2c   :  { %497 = vmatprep.subr.bf16.mxu1 %v528_v8  ;;  %433 = vmatprep.subr.bf16.mxu0 %v528_v8 }
  0x2f   :  { %505 = vmatpush3.bf16.msra.mxu1 %v529_v9  ;;  %434 = vmatpush3.bf16.msra.mxu0 %v529_v9 }
  0x30   :  { %498 = vmatprep.subr.bf16.mxu1 %v530_v10  ;;  %435 = vmatprep.subr.bf16.mxu0 %v530_v10 }
  0x33   :  { %506 = vmatpush3.bf16.msra.mxu1 %v531_v13  ;;  %436 = vmatpush3.bf16.msra.mxu0 %v531_v13 }
  0x34   :  { %499 = vmatprep.subr.bf16.mxu1 %v532_v14  ;;  %437 = vmatprep.subr.bf16.mxu0 %v532_v14 }
  0x37   :  { %507 = vmatpush3.bf16.msra.mxu1 %v533_v15  ;;  %438 = vmatpush3.bf16.msra.mxu0 %v533_v15 }
  0x38   :  { %500 = vmatprep.subr.bf16.mxu1 %v534_v16  ;;  %439 = vmatprep.subr.bf16.mxu0 %v534_v16 }
  0x3b   :  { %508 = vmatpush3.bf16.msra.mxu1 %v535_v17  ;;  %440 = vmatpush3.bf16.msra.mxu0 %v535_v17 }
  0x3c   :  { %474 = vmatprep.subr.mxu1 %v620_v24 }
  0x3e   :  { %275 = vmatmul.mubr.bf16.vlgmr.msra.gmra.mxu1 %v536_v18  ;;  %259 = vmatmul.mubr.bf16.vlgmr.msra.gmra.mxu0 %v539_v19 }
  0x3f   :  { %282 = vmatprep.mubr.bf16.mxu1 %v542_v20  ;;  %266 = vmatprep.mubr.bf16.mxu0 %v545_v21 }
  0x46   :  { %283 = vmatmul.mubr.bf16.gmra.mxu1 %v544_v22  ;;  %267 = vmatmul.mubr.bf16.gmra.mxu0 %v547_v23 }
  0x47   :  { %490 = vmatprep.mubr.msk.f32.mxu1 %vm621_vm0, %v620_v24 }
  0xa1   :  { %v378_v54 = vpop.permute.xlu0 %377 }
  0xfe   :  { %v453_v27 = vpop.f32.mrf.mxu1  ;;  %v441_v28 = vpop.f32.mrf.mxu0 }
 0x100   :  { %v454_v29 = vpop.f32.mrf.mxu1  ;;  %v442_v30 = vpop.f32.mrf.mxu0 }
 0x101   :  { %v455_v46 = vadd.f32 %v454_v29, %v453_v27  ;;  %v443_v50 = vadd.f32 %v442_v30, %v441_v28 }
 0x102   :  { %v456_v31 = vpop.f32.mrf.mxu1  ;;  %v444_v32 = vpop.f32.mrf.mxu0 }
 0x104   :  { %v457_v33 = vpop.f32.mrf.mxu1  ;;  %v445_v34 = vpop.f32.mrf.mxu0 }
 0x105   :  { %v458_v44 = vadd.f32 %v457_v33, %v456_v31  ;;  %v446_v49 = vadd.f32 %v445_v34, %v444_v32 }
 0x106   :  { %v459_v35 = vpop.f32.mrf.mxu1  ;;  %v447_v36 = vpop.f32.mrf.mxu0 }
 0x108   :  { %v460_v37 = vpop.f32.mrf.mxu1  ;;  %v448_v38 = vpop.f32.mrf.mxu0 }
 0x109   :  { %v461_v43 = vadd.f32 %v460_v37, %v459_v35  ;;  %v449_v48 = vadd.f32 %v448_v38, %v447_v36 }
 0x10a   :  { %v462_v39 = vpop.f32.mrf.mxu1  ;;  %v450_v42 = vpop.f32.mrf.mxu0 }
 0x10c   :  { %v463_v40 = vpop.f32.mrf.mxu1  ;;  %v451_v45 = vpop.f32.mrf.mxu0 }
 0x10d   :  { %v464_v41 = vadd.f32 %v463_v40, %v462_v39  ;;  %v452_v47 = vadd.f32 %v451_v45, %v450_v42 }
 0x10f   :  { %475 = vmatpush3.msra.mxu1 %v464_v41 }
 0x110   :  { %476 = vmatprep.subr.mxu1 %v620_v24 }
 0x111   :  { %477 = vmatpush3.msra.mxu1 %v461_v43 }
 0x112   :  { %478 = vmatprep.subr.mxu1 %v620_v24 }
 0x113   :  { %479 = vmatpush3.msra.mxu1 %v458_v44 }
 0x114   :  { %480 = vmatprep.subr.mxu1 %v620_v24 }
 0x115   :  { %481 = vmatpush3.msra.mxu1 %v455_v46 }
 0x116   :  { %482 = vmatprep.subr.mxu1 %v620_v24 }
 0x117   :  { %483 = vmatpush3.msra.mxu1 %v452_v47 }
 0x118   :  { %484 = vmatprep.subr.mxu1 %v620_v24 }
 0x119   :  { %485 = vmatpush3.msra.mxu1 %v449_v48 }
 0x11a   :  { %486 = vmatprep.subr.mxu1 %v620_v24 }
 0x11b   :  { %487 = vmatpush3.msra.mxu1 %v446_v49 }
 0x11c   :  { %488 = vmatprep.subr.mxu1 %v620_v24 }
 0x11d   :  { %489 = vmatpush3.msra.mxu1 %v443_v50 }
 0x11e   :  { %491 = vmatmul.mubr.msk.f32.vlgmr.msra.gmra.mxu1 %vm292_vm1, %v291_v51 }
 0x1de   :  { %v362_v53 = vpop.f32.mrf.mxu1 }
 0x1df   :  { %v373_v55 = vmul.f32 %v424_v52, %v362_v53 }
 0x1e0   :  { %v492_v56 = vpop.f32.mrf.mxu1 }
 0x1e1   :  { %v380_v57 = vadd.f32 %v378_v54, %v373_v55 }
 0x1e3   :  { %v381_v58 = vmax.f32 %v380_v57, 0.0 }
 0x1e5   :  { %382 = vst [vmem:[#allocation7] sm:$0xf] %v381_v58 }
 0x1e6   :  { %599 = shalt.err (!%p596_p0)
}
 0x1e7   :  { %392 = dma.vmem_to_hbm [thread:$0]  %s390_s11, 64, %s677_s5, [#allocation4]  }
 0x1e8   :  { %612 = dma.done.wait [#allocation4], 64  }
 0x1e9   :  { %613 = vsyncadd [#allocation4], 4294967232 }
 0x1ea   :  { %396 = vsyncpa [#allocation3], 1 }
 0x1eb   :  { %397 = vsyncpa [#allocation6], 1 }
 0x1ec   :  { %398 = vsyncpa [#allocation4], 1 }

// kernel: tpu_custom_call.1
= control target key start
LH: loop header
LB: loop body
LE: loop exit
PB: predicated region body
PF: predicated region fallthrough
CT: control target
= control target key end

     0   :  { %10 = vsyncpa [#allocation3], 0  ;;  %s672_s0 = inlined_call_operand.hbm [shape: bf16[64,256], index: 0, kind: input, shape index: {}]   ;;  %s673_s1 = inlined_call_operand.hbm [shape: bf16[256,128], index: 1, kind: input, shape index: {}]   ;;  %s674_s2 = inlined_call_operand.vmem [shape: f32[4,64], index: 2, kind: input, shape index: {}]   ;;  %s675_s3 = inlined_call_operand.vmem [shape: f32[4,1], index: 3, kind: input, shape index: {}]   ;;  %s676_s4 = inlined_call_operand.vmem [shape: f32[1,128], index: 4, kind: input, shape index: {}]   ;;  %s677_s5 = inlined_call_operand.hbm [shape: f32[1,4,128], index: 5, kind: output, shape index: {}]  }
   0x1   :  { %11 = vsyncpa [#allocation6], 0 }
   0x2   :  { %12 = vsyncpa [#allocation4], 0  ;;  %s614_s18 = smov [#allocation2]  }
   0x3   :  { %s18_s19 = sshll.u32 %s614_s18, 4  ;;  %s19_s19 = int_to_ptr.vmem [resolvable:$true] %s18_s19 }
   0x4   :  { %s556_s20 = scalar_lea.vmem %s19_s19, 1024  ;;  %p561_p1 = scmp.lt.s32.totalorder %s19_s19, %s19_s19 }
   0x5   :  { %p557_p0 = scmp.ne.s32.totalorder %s19_s19, %s556_s20  ;;  %p562_p2 = scmp.lt.s32.totalorder %s556_s20, %s556_s20 }
   0x7   :  { %p563_p3 = por %p562_p2, %p561_p1 }
   0x9   :  { %p564_p4 = pnand %p563_p3, %p557_p0 }
   0xb   :  { %567 = shalt.err (!%p564_p4)
}
   0xc   :  { %s615_s21 = smov 128   ;;  %s616_s22 = smov 8  }
   0xd   :  { %24 = dma.hbm_to_vmem [thread:$0]  %s672_s0, 1024, %s19_s19, [#allocation3], %s615_s21, %s615_s21, %s616_s22  }
   0xe   :  { %s617_s25 = smov [#allocation5]  }
   0xf   :  { %s30_s26 = sshll.u32 %s617_s25, 4  ;;  %s31_s26 = int_to_ptr.vmem [resolvable:$true] %s30_s26 }
  0x10   :  { %s576_s27 = scalar_lea.vmem %s31_s26, 2048  ;;  %p581_p6 = scmp.lt.s32.totalorder %s31_s26, %s31_s26 }
  0x11   :  { %p577_p5 = scmp.ne.s32.totalorder %s31_s26, %s576_s27  ;;  %p582_p7 = scmp.lt.s32.totalorder %s576_s27, %s576_s27 }
  0x13   :  { %p583_p8 = por %p582_p7, %p581_p6 }
  0x15   :  { %p584_p9 = pnand %p583_p8, %p577_p5 }
  0x17   :  { %587 = shalt.err (!%p584_p9)
}
  0x18   :  { %s618_s28 = smov 64   ;;  %s619_s29 = smov 4  }
  0x19   :  { %36 = dma.hbm_to_vmem [thread:$0]  %s673_s1, 2048, %s31_s26, [#allocation6], %s618_s28, %s618_s28, %s619_s29  }
  0x1a   :  { %608 = dma.done.wait [#allocation3], 1024  }
  0x1b   :  { %609 = vsyncadd [#allocation3], 4294966272 }
  0x1c   :  { %610 = dma.done.wait [#allocation6], 2048  }
  0x1d   :  { %611 = vsyncadd [#allocation6], 4294965248  ;;  %v520_v0 = vld [vmem:[#allocation5 + $0x78] sm:$0xff]   ;;  %v522_v2 = vld [vmem:[#allocation5 + $0x70] sm:$0xff]   ;;  %v620_v24 = vmov 0.0   ;;  %vm621_vm0 = vmmov 0  }
  0x1e   :  { %v521_v1 = vld [vmem:[#allocation5 + $0x38] sm:$0xff]   ;;  %493 = vmatprep.subr.bf16.mxu1 %v520_v0  ;;  %425 = vmatprep.subr.bf16.mxu0 %v520_v0  ;;  %v523_v3 = vld [vmem:[#allocation5 + $0x30] sm:$0xff]   ;;  %v524_v4 = vld [vmem:[#allocation5 + $0x68] sm:$0xff]   ;;  %v622_v26 = vmov 0   ;;  %vm292_vm1 = vcmask 523264   ;;  %s623_s10 = smov [#allocation7]  }
  0x1f   :  { %501 = vmatpush3.bf16.msra.mxu1 %v521_v1  ;;  %426 = vmatpush3.bf16.msra.mxu0 %v521_v1  ;;  %v525_v5 = vld [vmem:[#allocation5 + $0x28] sm:$0xff]   ;;  %v526_v6 = vld [vmem:[#allocation5 + $0x60] sm:$0xff]   ;;  %v528_v8 = vld [vmem:[#allocation5 + $0x58] sm:$0xff]   ;;  %s389_s11 = sshll.u32 %s623_s10, 4  ;;  %s390_s11 = int_to_ptr.vmem [resolvable:$true] %s389_s11 }
  0x20   :  { %494 = vmatprep.subr.bf16.mxu1 %v522_v2  ;;  %427 = vmatprep.subr.bf16.mxu0 %v522_v2  ;;  %v527_v7 = vld [vmem:[#allocation5 + $0x20] sm:$0xff]   ;;  %v529_v9 = vld [vmem:[#allocation5 + $0x18] sm:$0xff]   ;;  %v530_v10 = vld [vmem:[#allocation5 + $0x50] sm:$0xff]   ;;  %s588_s12 = scalar_lea.vmem %s390_s11, 64  ;;  %p593_p11 = scmp.lt.s32.totalorder %s390_s11, %s390_s11 }
  0x21   :  { %v538_v11 = vld [vmem:[#allocation2 + $0x24] ss:$8 sps:$4 sm:$0xff]   ;;  %v531_v13 = vld [vmem:[#allocation5 + $0x10] sm:$0xff]   ;;  %v536_v18 = vld [vmem:[#allocation2 + $0x20] ss:$8 sps:$4 sm:$0xff]   ;;  %519 = vset.pattern.permute.xlu0 %v622_v26  ;;  %p589_p10 = scmp.ne.s32.totalorder %s390_s11, %s588_s12  ;;  %p594_p12 = scmp.lt.s32.totalorder %s588_s12, %s588_s12 }
  0x22   :  { %v541_v12 = vld [vmem:[#allocation2 + $0x4] ss:$8 sps:$4 sm:$0xff]   ;;  %274 = vmatprep.mubr.bf16.mxu1 %v538_v11  ;;  %v539_v19 = vld [vmem:[#allocation2] ss:$8 sps:$4 sm:$0xff]   ;;  %v542_v20 = vld [vmem:[#allocation2 + $0x34] ss:$8 sps:$4 sm:$0xff]  }
  0x23   :  { %502 = vmatpush3.bf16.msra.mxu1 %v523_v3  ;;  %428 = vmatpush3.bf16.msra.mxu0 %v523_v3  ;;  %v532_v14 = vld [vmem:[#allocation5 + $0x48] sm:$0xff]   ;;  %v534_v16 = vld [vmem:[#allocation5 + $0x40] sm:$0xff]   ;;  %v545_v21 = vld [vmem:[#allocation2 + $0x14] ss:$8 sps:$4 sm:$0xff]   ;;  %p595_p13 = por %p594_p12, %p593_p11 }
  0x24   :  { %495 = vmatprep.subr.bf16.mxu1 %v524_v4  ;;  %429 = vmatprep.subr.bf16.mxu0 %v524_v4  ;;  %v533_v15 = vld [vmem:[#allocation5 + $0x8] sm:$0xff]   ;;  %v535_v17 = vld [vmem:[#allocation5] sm:$0xff]   ;;  %v544_v22 = vld [vmem:[#allocation2 + $0x30] ss:$8 sps:$4 sm:$0xff]  }
  0x25   :  { %258 = vmatprep.mubr.bf16.mxu0 %v541_v12  ;;  %v547_v23 = vld [vmem:[#allocation2 + $0x10] ss:$8 sps:$4 sm:$0xff]   ;;  %v374_v25 = vld [vmem:[%s675_s3] sm:$0xf]  ;;  %p596_p0 = pnand %p595_p13, %p589_p10 }
  0x26   :  { %377 = vperm.xlu0 %519, %v374_v25   ;;  %v291_v51 = vld [vmem:[%s674_s2] sm:$0xf] }
  0x27   :  { %503 = vmatpush3.bf16.msra.mxu1 %v525_v5  ;;  %430 = vmatpush3.bf16.msra.mxu0 %v525_v5  ;;  %v424_v52 = vld [vmem:[%s676_s4] ss:$0 sm:$0xff] }
  0x28   :  { %496 = vmatprep.subr.bf16.mxu1 %v526_v6  ;;  %431 = vmatprep.subr.bf16.mxu0 %v526_v6 }
  0x2b   :  { %504 = vmatpush3.bf16.msra.mxu1 %v527_v7  ;;  %432 = vmatpush3.bf16.msra.mxu0 %v527_v7 }
  0x2c   :  { %497 = vmatprep.subr.bf16.mxu1 %v528_v8  ;;  %433 = vmatprep.subr.bf16.mxu0 %v528_v8 }
  0x2f   :  { %505 = vmatpush3.bf16.msra.mxu1 %v529_v9  ;;  %434 = vmatpush3.bf16.msra.mxu0 %v529_v9 }
  0x30   :  { %498 = vmatprep.subr.bf16.mxu1 %v530_v10  ;;  %435 = vmatprep.subr.bf16.mxu0 %v530_v10 }
  0x33   :  { %506 = vmatpush3.bf16.msra.mxu1 %v531_v13  ;;  %436 = vmatpush3.bf16.msra.mxu0 %v531_v13 }
  0x34   :  { %499 = vmatprep.subr.bf16.mxu1 %v532_v14  ;;  %437 = vmatprep.subr.bf16.mxu0 %v532_v14 }
  0x37   :  { %507 = vmatpush3.bf16.msra.mxu1 %v533_v15  ;;  %438 = vmatpush3.bf16.msra.mxu0 %v533_v15 }
  0x38   :  { %500 = vmatprep.subr.bf16.mxu1 %v534_v16  ;;  %439 = vmatprep.subr.bf16.mxu0 %v534_v16 }
  0x3b   :  { %508 = vmatpush3.bf16.msra.mxu1 %v535_v17  ;;  %440 = vmatpush3.bf16.msra.mxu0 %v535_v17 }
  0x3c   :  { %474 = vmatprep.subr.mxu1 %v620_v24 }
  0x3e   :  { %275 = vmatmul.mubr.bf16.vlgmr.msra.gmra.mxu1 %v536_v18  ;;  %259 = vmatmul.mubr.bf16.vlgmr.msra.gmra.mxu0 %v539_v19 }
  0x3f   :  { %282 = vmatprep.mubr.bf16.mxu1 %v542_v20  ;;  %266 = vmatprep.mubr.bf16.mxu0 %v545_v21 }
  0x46   :  { %283 = vmatmul.mubr.bf16.gmra.mxu1 %v544_v22  ;;  %267 = vmatmul.mubr.bf16.gmra.mxu0 %v547_v23 }
  0x47   :  { %490 = vmatprep.mubr.msk.f32.mxu1 %vm621_vm0, %v620_v24 }
  0xa1   :  { %v378_v54 = vpop.permute.xlu0 %377 }
  0xfe   :  { %v453_v27 = vpop.f32.mrf.mxu1  ;;  %v441_v28 = vpop.f32.mrf.mxu0 }
 0x100   :  { %v454_v29 = vpop.f32.mrf.mxu1  ;;  %v442_v30 = vpop.f32.mrf.mxu0 }
 0x101   :  { %v455_v46 = vadd.f32 %v454_v29, %v453_v27  ;;  %v443_v50 = vadd.f32 %v442_v30, %v441_v28 }
 0x102   :  { %v456_v31 = vpop.f32.mrf.mxu1  ;;  %v444_v32 = vpop.f32.mrf.mxu0 }
 0x104   :  { %v457_v33 = vpop.f32.mrf.mxu1  ;;  %v445_v34 = vpop.f32.mrf.mxu0 }
 0x105   :  { %v458_v44 = vadd.f32 %v457_v33, %v456_v31  ;;  %v446_v49 = vadd.f32 %v445_v34, %v444_v32 }
 0x106   :  { %v459_v35 = vpop.f32.mrf.mxu1  ;;  %v447_v36 = vpop.f32.mrf.mxu0 }
 0x108   :  { %v460_v37 = vpop.f32.mrf.mxu1  ;;  %v448_v38 = vpop.f32.mrf.mxu0 }
 0x109   :  { %v461_v43 = vadd.f32 %v460_v37, %v459_v35  ;;  %v449_v48 = vadd.f32 %v448_v38, %v447_v36 }
 0x10a   :  { %v462_v39 = vpop.f32.mrf.mxu1  ;;  %v450_v42 = vpop.f32.mrf.mxu0 }
 0x10c   :  { %v463_v40 = vpop.f32.mrf.mxu1  ;;  %v451_v45 = vpop.f32.mrf.mxu0 }
 0x10d   :  { %v464_v41 = vadd.f32 %v463_v40, %v462_v39  ;;  %v452_v47 = vadd.f32 %v451_v45, %v450_v42 }
 0x10f   :  { %475 = vmatpush3.msra.mxu1 %v464_v41 }
 0x110   :  { %476 = vmatprep.subr.mxu1 %v620_v24 }
 0x111   :  { %477 = vmatpush3.msra.mxu1 %v461_v43 }
 0x112   :  { %478 = vmatprep.subr.mxu1 %v620_v24 }
 0x113   :  { %479 = vmatpush3.msra.mxu1 %v458_v44 }
 0x114   :  { %480 = vmatprep.subr.mxu1 %v620_v24 }
 0x115   :  { %481 = vmatpush3.msra.mxu1 %v455_v46 }
 0x116   :  { %482 = vmatprep.subr.mxu1 %v620_v24 }
 0x117   :  { %483 = vmatpush3.msra.mxu1 %v452_v47 }
 0x118   :  { %484 = vmatprep.subr.mxu1 %v620_v24 }
 0x119   :  { %485 = vmatpush3.msra.mxu1 %v449_v48 }
 0x11a   :  { %486 = vmatprep.subr.mxu1 %v620_v24 }
 0x11b   :  { %487 = vmatpush3.msra.mxu1 %v446_v49 }
 0x11c   :  { %488 = vmatprep.subr.mxu1 %v620_v24 }
 0x11d   :  { %489 = vmatpush3.msra.mxu1 %v443_v50 }
 0x11e   :  { %491 = vmatmul.mubr.msk.f32.vlgmr.msra.gmra.mxu1 %vm292_vm1, %v291_v51 }
 0x1de   :  { %v362_v53 = vpop.f32.mrf.mxu1 }
 0x1df   :  { %v373_v55 = vmul.f32 %v424_v52, %v362_v53 }
 0x1e0   :  { %v492_v56 = vpop.f32.mrf.mxu1 }
 0x1e1   :  { %v380_v57 = vadd.f32 %v378_v54, %v373_v55 }
 0x1e3   :  { %v381_v58 = vmax.f32 %v380_v57, 0.0 }
 0x1e5   :  { %382 = vst [vmem:[#allocation7] sm:$0xf] %v381_v58 }
 0x1e6   :  { %599 = shalt.err (!%p596_p0)
}
 0x1e7   :  { %392 = dma.vmem_to_hbm [thread:$0]  %s390_s11, 64, %s677_s5, [#allocation4]  }
 0x1e8   :  { %612 = dma.done.wait [#allocation4], 64  }
 0x1e9   :  { %613 = vsyncadd [#allocation4], 4294967232 }
 0x1ea   :  { %396 = vsyncpa [#allocation3], 1 }
 0x1eb   :  { %397 = vsyncpa [#allocation6], 1 }
 0x1ec   :  { %398 = vsyncpa [#allocation4], 1 }

</bundles_post_ra>
